<compile_context>
chip_gen: v5e
topology: v5e:2x2
jax: 0.10.0
libtpu: 0.0.40
codegen_flags: <defaults>
</compile_context>

<pallas_src>
import math
import jax
import jax.numpy as jnp
from jax.experimental import pallas as pl
from jax.experimental.pallas import tpu as pltpu


def _gelu_exact(x):
    # torch.nn.GELU() default == exact erf-based GELU (computed in f32)
    return 0.5 * x * (1.0 + jax.lax.erf(x * (1.0 / math.sqrt(2.0))))


def _predictor_kernel(x_ref, w1_ref, b1_ref, w2_ref, b2_ref, o_ref):
    x = x_ref[...]                                   # (TM, Kp) bf16
    # fc1 (MXU, bf16 operands, f32 accumulate) + bias + GELU in f32; dropout(p=0) = identity
    h = jnp.dot(x, w1_ref[...], preferred_element_type=jnp.float32) + b1_ref[...]
    h = _gelu_exact(h)
    # fc2 + bias + GELU; dropout(p=0) = identity
    h = h.astype(jnp.bfloat16)
    y = jnp.dot(h, w2_ref[...], preferred_element_type=jnp.float32) + b2_ref[...]
    y = _gelu_exact(y)
    o_ref[...] = y.astype(o_ref.dtype)


def _round_up(n, mult):
    return ((n + mult - 1) // mult) * mult


def _choose_tm(m, k_pad, h_pad, n_pad, vmem_budget_bytes=24 * 1024 * 1024):
    """Largest TM in {512, 256, ..., 8} whose (double-buffered) tiles fit the VMEM budget."""
    # Weights/biases: count x2 to be conservative about the pipeline's buffering.
    weight_bytes = 2 * (k_pad * h_pad * 2 + h_pad * n_pad * 2 + (h_pad + n_pad) * 4)
    tm = 512
    while tm > 8:
        per_row = 2 * (k_pad * 2 + n_pad * 4) + h_pad * 4  # dbl-buffered x(bf16)/out(f32) + f32 intermediate
        if weight_bytes + tm * per_row <= vmem_budget_bytes:
            break
        tm //= 2
    if m < tm:
        tm = max(8, _round_up(m, 8))
    return tm


def predictor_forward(x, w1, b1, w2, b2, *, tm=None, lane=128):
    """x: (..., in_dim) f32; w1: (in_dim, hidden); b1: (1, hidden);
       w2: (hidden, out_dim); b2: (1, out_dim).  Weights pre-transposed vs torch."""
    in_dim = x.shape[-1]
    hidden_dim = w1.shape[1]
    out_dim = w2.shape[1]
    lead_shape = x.shape[:-1]
    m = math.prod(lead_shape) if lead_shape else 1

    k_pad = _round_up(in_dim, lane)
    h_pad = _round_up(hidden_dim, lane)
    n_pad = _round_up(out_dim, lane)

    x2d = x.reshape(m, in_dim)
    # Zero-pad feature dims to lane width; cast MXU operands to bf16 once here.
    x_p = jnp.pad(x2d, ((0, 0), (0, k_pad - in_dim))).astype(jnp.bfloat16)
    w1_p = jnp.pad(w1, ((0, k_pad - in_dim), (0, h_pad - hidden_dim))).astype(jnp.bfloat16)
    b1_p = jnp.pad(b1, ((0, 0), (0, h_pad - hidden_dim))).astype(jnp.float32)
    w2_p = jnp.pad(w2, ((0, h_pad - hidden_dim), (0, n_pad - out_dim))).astype(jnp.bfloat16)
    b2_p = jnp.pad(b2, ((0, 0), (0, n_pad - out_dim))).astype(jnp.float32)

    if tm is None:
        tm = _choose_tm(m, k_pad, h_pad, n_pad)
    grid = (pl.cdiv(m, tm),)

    cost = pl.CostEstimate(
        flops=2 * m * (k_pad * h_pad + h_pad * n_pad),
        transcendentals=m * (h_pad + n_pad),
        bytes_accessed=(m * k_pad * 2 + k_pad * h_pad * 2 + h_pad * n_pad * 2
                        + (h_pad + n_pad) * 4 + m * n_pad * 4),
    )

    out2d = pl.pallas_call(
        _predictor_kernel,
        out_shape=jax.ShapeDtypeStruct((m, n_pad), x.dtype),
        grid_spec=pl.GridSpec(
            grid=grid,
            in_specs=[
                pl.BlockSpec((tm, k_pad), lambda i: (i, 0)),      # x tile, pipelined over M
                pl.BlockSpec((k_pad, h_pad), lambda i: (0, 0)),   # w1, VMEM-resident
                pl.BlockSpec((1, h_pad), lambda i: (0, 0)),       # b1
                pl.BlockSpec((h_pad, n_pad), lambda i: (0, 0)),   # w2
                pl.BlockSpec((1, n_pad), lambda i: (0, 0)),       # b2
            ],
            out_specs=pl.BlockSpec((tm, n_pad), lambda i: (i, 0)),
        ),
        compiler_params=pltpu.CompilerParams(
            dimension_semantics=("parallel",),          # dual-TC sharding on v7x
            vmem_limit_bytes=32 * 1024 * 1024,          # fits v7x's 64 MiB / 32 MiB scoped VMEM
        ),
        cost_estimate=cost,
    )(x_p, w1_p, b1_p, w2_p, b2_p)

    return out2d[:, :out_dim].reshape(*lead_shape, out_dim)


def _init_linear(key, fan_in, fan_out):
    """Deterministic init mimicking torch.nn.Linear (kaiming-uniform-ish)."""
    kw, kb = jax.random.split(key)
    bound = 1.0 / math.sqrt(fan_in)
    # stored pre-transposed: (fan_in, fan_out)
    w = jax.random.uniform(kw, (fan_in, fan_out), jnp.float32, -bound, bound)
    b = jax.random.uniform(kb, (1, fan_out), jnp.float32, -bound, bound)
    return w, b


if __name__ == "__main__":
    # Small shapes: batch=2, seq=8, in_dim=32, hidden=64, out_dim=32
    in_dim, hidden_dim, out_dim = 32, 64, 32
    key = jax.random.PRNGKey(0)
    kx, k1, k2 = jax.random.split(key, 3)

    x = jax.random.normal(kx, (2, 8, in_dim), jnp.float32)
    w1, b1 = _init_linear(k1, in_dim, hidden_dim)
    w2, b2 = _init_linear(k2, hidden_dim, out_dim)

    out = predictor_forward(x, w1, b1, w2, b2)
    out = jax.block_until_ready(out)

    # Pure-JAX f32 reference (same semantics as the torch module with drop=0.0).
    # Kernel uses bf16 MXU operands -> compare with a loose tolerance.
    def ref(x):
        h = _gelu_exact(x @ w1 + b1[0])
        return _gelu_exact(h @ w2 + b2[0])

    ref_out = ref(x)
    assert out.shape == (2, 8, out_dim)
    assert bool(jnp.all(jnp.isfinite(out)))
    max_err = float(jnp.max(jnp.abs(out - ref_out)))
    assert max_err < 5e-2, f"mismatch vs reference, max abs err = {max_err}"

    print("KERNEL_OK")
</pallas_src>

<mosaic_0001>
module attributes {stable_mosaic.version = 11 : i64} {
  func.func @_predictor_kernel(%arg0: i32, %arg1: memref<16x128xbf16, #tpu.memory_space<vmem>>, %arg2: memref<128x128xbf16, #tpu.memory_space<vmem>>, %arg3: memref<1x128xf32, #tpu.memory_space<vmem>>, %arg4: memref<128x128xbf16, #tpu.memory_space<vmem>>, %arg5: memref<1x128xf32, #tpu.memory_space<vmem>>, %arg6: memref<16x128xf32, #tpu.memory_space<vmem>>) attributes {dimension_semantics = [#tpu.dimension_semantics<parallel>], iteration_bounds = array<i64: 1>, scalar_prefetch = 0 : i64, scratch_operands = 0 : i64, tpu.core_type = #tpu.core_type<tc>, window_params = [{transform_indices = @transform_0, window_bounds = array<i64: 16, 128>}, {pipeline_mode = #tpu.pipeline_mode<synchronous>, transform_indices = @transform_1, window_bounds = array<i64: 128, 128>}, {pipeline_mode = #tpu.pipeline_mode<synchronous>, transform_indices = @transform_2, window_bounds = array<i64: 1, 128>}, {pipeline_mode = #tpu.pipeline_mode<synchronous>, transform_indices = @transform_3, window_bounds = array<i64: 128, 128>}, {pipeline_mode = #tpu.pipeline_mode<synchronous>, transform_indices = @transform_4, window_bounds = array<i64: 1, 128>}, {transform_indices = @transform_5, window_bounds = array<i64: 16, 128>}]} {
    %c0 = arith.constant 0 : index
    %c0_0 = arith.constant 0 : index
    %0 = vector.load %arg1[%c0, %c0_0] : memref<16x128xbf16, #tpu.memory_space<vmem>>, vector<16x128xbf16>
    %c0_1 = arith.constant 0 : index
    %c0_2 = arith.constant 0 : index
    %1 = vector.load %arg2[%c0_1, %c0_2] : memref<128x128xbf16, #tpu.memory_space<vmem>>, vector<128x128xbf16>
    %cst = arith.constant dense<0.000000e+00> : vector<16x128xf32>
    %2 = tpu.matmul %0, %1, %cst {dimension_numbers = #tpu.dot_dimension_numbers<[1], [0], [0], [1], [0, 0, 1, 1], [], []>} : vector<16x128xbf16>, vector<128x128xbf16>, vector<16x128xf32> -> vector<16x128xf32>
    %c0_3 = arith.constant 0 : index
    %c0_4 = arith.constant 0 : index
    %3 = vector.load %arg3[%c0_3, %c0_4] : memref<1x128xf32, #tpu.memory_space<vmem>>, vector<1x128xf32>
    %4 = vector.broadcast %3 : vector<1x128xf32> to vector<16x128xf32>
    %5 = arith.addf %2, %4 : vector<16x128xf32>
    %cst_5 = arith.constant 5.000000e-01 : f32
    %6 = vector.broadcast %cst_5 : f32 to vector<16x128xf32>
    %7 = arith.mulf %6, %5 : vector<16x128xf32>
    %cst_6 = arith.constant 0.707106769 : f32
    %8 = vector.broadcast %cst_6 : f32 to vector<16x128xf32>
    %9 = arith.mulf %5, %8 : vector<16x128xf32>
    %10 = math.erf %9 : vector<16x128xf32>
    %cst_7 = arith.constant 1.000000e+00 : f32
    %11 = vector.broadcast %cst_7 : f32 to vector<16x128xf32>
    %12 = arith.addf %11, %10 : vector<16x128xf32>
    %13 = arith.mulf %7, %12 : vector<16x128xf32>
    %14 = arith.truncf %13 : vector<16x128xf32> to vector<16x128xbf16>
    %c0_8 = arith.constant 0 : index
    %c0_9 = arith.constant 0 : index
    %15 = vector.load %arg4[%c0_8, %c0_9] : memref<128x128xbf16, #tpu.memory_space<vmem>>, vector<128x128xbf16>
    %cst_10 = arith.constant dense<0.000000e+00> : vector<16x128xf32>
    %16 = tpu.matmul %14, %15, %cst_10 {dimension_numbers = #tpu.dot_dimension_numbers<[1], [0], [0], [1], [0, 0, 1, 1], [], []>} : vector<16x128xbf16>, vector<128x128xbf16>, vector<16x128xf32> -> vector<16x128xf32>
    %c0_11 = arith.constant 0 : index
    %c0_12 = arith.constant 0 : index
    %17 = vector.load %arg5[%c0_11, %c0_12] : memref<1x128xf32, #tpu.memory_space<vmem>>, vector<1x128xf32>
    %18 = vector.broadcast %17 : vector<1x128xf32> to vector<16x128xf32>
    %19 = arith.addf %16, %18 : vector<16x128xf32>
    %cst_13 = arith.constant 5.000000e-01 : f32
    %20 = vector.broadcast %cst_13 : f32 to vector<16x128xf32>
    %21 = arith.mulf %20, %19 : vector<16x128xf32>
    %cst_14 = arith.constant 0.707106769 : f32
    %22 = vector.broadcast %cst_14 : f32 to vector<16x128xf32>
    %23 = arith.mulf %19, %22 : vector<16x128xf32>
    %24 = math.erf %23 : vector<16x128xf32>
    %cst_15 = arith.constant 1.000000e+00 : f32
    %25 = vector.broadcast %cst_15 : f32 to vector<16x128xf32>
    %26 = arith.addf %25, %24 : vector<16x128xf32>
    %27 = arith.mulf %21, %26 : vector<16x128xf32>
    %c0_16 = arith.constant 0 : index
    %c0_17 = arith.constant 0 : index
    %28 = vector.load %arg6[%c0_16, %c0_17] : memref<16x128xf32, #tpu.memory_space<vmem>>, vector<16x128xf32>
    tpu.vector_store %arg6[%c0_16, %c0_17], %27 {strides = array<i32>} : memref<16x128xf32, #tpu.memory_space<vmem>>, vector<16x128xf32>,
    return
  }
  func.func @transform_0(%arg0: i32) -> (i32, i32) {
    %c0_i32 = arith.constant 0 : i32
    %c0_i32_0 = arith.constant 0 : i32
    return %arg0, %c0_i32 : i32, i32
  }
  func.func @transform_1(%arg0: i32) -> (i32, i32) {
    %c0_i32 = arith.constant 0 : i32
    %c0_i32_0 = arith.constant 0 : i32
    %c0_i32_1 = arith.constant 0 : i32
    return %c0_i32, %c0_i32_0 : i32, i32
  }
  func.func @transform_2(%arg0: i32) -> (i32, i32) {
    %c0_i32 = arith.constant 0 : i32
    %c0_i32_0 = arith.constant 0 : i32
    %c0_i32_1 = arith.constant 0 : i32
    return %c0_i32, %c0_i32_0 : i32, i32
  }
  func.func @transform_3(%arg0: i32) -> (i32, i32) {
    %c0_i32 = arith.constant 0 : i32
    %c0_i32_0 = arith.constant 0 : i32
    %c0_i32_1 = arith.constant 0 : i32
    return %c0_i32, %c0_i32_0 : i32, i32
  }
  func.func @transform_4(%arg0: i32) -> (i32, i32) {
    %c0_i32 = arith.constant 0 : i32
    %c0_i32_0 = arith.constant 0 : i32
    %c0_i32_1 = arith.constant 0 : i32
    return %c0_i32, %c0_i32_0 : i32, i32
  }
  func.func @transform_5(%arg0: i32) -> (i32, i32) {
    %c0_i32 = arith.constant 0 : i32
    %c0_i32_0 = arith.constant 0 : i32
    return %arg0, %c0_i32 : i32, i32
  }
}

</mosaic_0001>

<bundles_post_ra>
// kernel: tpu_custom_call.1
= control target key start
LH: loop header
LB: loop body
LE: loop exit
PB: predicated region body
PF: predicated region fallthrough
CT: control target
= control target key end

     0   :  { %10 = vsyncpa [#allocation3], 0  ;;  %s735_s0 = inlined_call_operand.hbm [shape: bf16[16,128], index: 0, kind: input, shape index: {}]   ;;  %s736_s1 = inlined_call_operand.hbm [shape: bf16[128,128], index: 1, kind: input, shape index: {}]   ;;  %s737_s2 = inlined_call_operand.vmem [shape: f32[1,128], index: 2, kind: input, shape index: {}]   ;;  %s738_s3 = inlined_call_operand.hbm [shape: bf16[128,128], index: 3, kind: input, shape index: {}]   ;;  %s739_s4 = inlined_call_operand.vmem [shape: f32[1,128], index: 4, kind: input, shape index: {}]   ;;  %s740_s5 = inlined_call_operand.hbm [shape: f32[16,128], index: 5, kind: output, shape index: {}]  }
   0x1   :  { %11 = vsyncpa [#allocation6], 0 }
   0x2   :  { %12 = vsyncpa [#allocation4], 0  ;;  %s30_s20 = sshll.u32 %s736_s1, 4  ;;  %s648_s21 = smov [#allocation5]   ;;  %s31_s20 = int_to_ptr.hbm [resolvable:$true] %s30_s20 }
   0x3   :  { %s32_s22 = sshll.u32 %s648_s21, 4  ;;  %s17_s25 = sshll.u32 %s735_s0, 4  ;;  %s33_s22 = int_to_ptr.vmem [resolvable:$true] %s32_s22  ;;  %s18_s25 = int_to_ptr.hbm [resolvable:$true] %s17_s25 }
   0x4   :  { %s649_s26 = smov 64   ;;  %s650_s27 = smov 4  }
   0x5   :  { %38 = dma.hbm_to_vmem [thread:$0]  %s31_s20, 1024, %s33_s22, [#allocation6], %s649_s26, %s649_s26, %s650_s27  }
   0x6   :  { %s651_s28 = smov [#allocation2]   ;;  %s45_s7 = sshll.u32 %s738_s3, 4  ;;  %s46_s7 = int_to_ptr.hbm [resolvable:$true] %s45_s7 }
   0x7   :  { %s19_s29 = sshll.u32 %s651_s28, 4  ;;  %s652_s1 = smov [#allocation7]   ;;  %s20_s29 = int_to_ptr.vmem [resolvable:$true] %s19_s29 }
   0x8   :  { %25 = dma.hbm_to_vmem [thread:$0]  %s18_s25, 128, %s20_s29, [#allocation3], %s649_s26, %s649_s26, %s650_s27  }
   0x9   :  { %s47_s8 = sshll.u32 %s652_s1, 4  ;;  %s48_s8 = int_to_ptr.vmem [resolvable:$true] %s47_s8 }
   0xa   :  { %53 = dma.hbm_to_vmem [thread:$0]  %s46_s7, 1024, %s48_s8, [#allocation6], %s649_s26, %s649_s26, %s650_s27  }
   0xb   :  { %642 = dma.done.wait [#allocation3], 128  }
   0xc   :  { %643 = vsyncadd [#allocation3], 4294967168 }
   0xd   :  { %644 = dma.done.wait [#allocation6], 2048  }
   0xe   :  { %645 = vsyncadd [#allocation6], 4294965248  ;;  %v519_v0 = vld [vmem:[#allocation5 + $0x38] sm:$0xff]  ;;  %v518_v1 = vld [vmem:[#allocation5 + $0x30] sm:$0xff]  ;;  %s425_s13 = sshll.u32 %s740_s5, 4  ;;  %s654_s14 = smov 128   ;;  %s426_s13 = int_to_ptr.hbm [resolvable:$true] %s425_s13 }
   0xf   :  { %144 = vmatpush.bf16.msra.mxu0 %v519_v0  ;;  %v517_v2 = vld [vmem:[#allocation5 + $0x28] sm:$0xff]  ;;  %v516_v3 = vld [vmem:[#allocation5 + $0x20] sm:$0xff]  ;;  %v515_v4 = vld [vmem:[#allocation5 + $0x18] sm:$0xff]  ;;  %s655_s15 = smov 8  }
  0x10   :  { %v514_v5 = vld [vmem:[#allocation5 + $0x10] sm:$0xff]  ;;  %v513_v6 = vld [vmem:[#allocation5 + $0x8] sm:$0xff]  ;;  %v512_v7 = vld [vmem:[#allocation5] sm:$0xff] }
  0x11   :  { %v511_v8 = vld [vmem:[#allocation2] sm:$0xff]  ;;  %v526_v14 = vld [vmem:[#allocation7 + $0x30] sm:$0xff]  ;;  %v525_v16 = vld [vmem:[#allocation7 + $0x28] sm:$0xff] }
  0x12   :  { %v536_v9 = vld [vmem:[%s737_s2] ss:$0 sm:$0xff]  ;;  %v524_v21 = vld [vmem:[#allocation7 + $0x20] sm:$0xff]  ;;  %v522_v33 = vld [vmem:[#allocation7 + $0x10] sm:$0xff] }
  0x13   :  { %145 = vmatpush.bf16.msra.mxu0 %v518_v1  ;;  %v527_v10 = vld [vmem:[#allocation7 + $0x38] sm:$0xff]  ;;  %v521_v41 = vld [vmem:[#allocation7 + $0x8] sm:$0xff]  ;;  %v520_v48 = vld [vmem:[#allocation7] sm:$0xff] }
  0x14   :  { %315 = vmatpush.bf16.msra.mxu1 %v527_v10  ;;  %v523_v27 = vld [vmem:[#allocation7 + $0x18] sm:$0xff] }
  0x17   :  { %146 = vmatpush.bf16.msra.mxu0 %v517_v2 }
  0x18   :  { %316 = vmatpush.bf16.msra.mxu1 %v526_v14 }
  0x1b   :  { %147 = vmatpush.bf16.msra.mxu0 %v516_v3 }
  0x1c   :  { %317 = vmatpush.bf16.msra.mxu1 %v525_v16 }
  0x1f   :  { %148 = vmatpush.bf16.msra.mxu0 %v515_v4 }
  0x20   :  { %318 = vmatpush.bf16.msra.mxu1 %v524_v21 }
  0x23   :  { %149 = vmatpush.bf16.msra.mxu0 %v514_v5 }
  0x24   :  { %319 = vmatpush.bf16.msra.mxu1 %v523_v27 }
  0x27   :  { %150 = vmatpush.bf16.msra.mxu0 %v513_v6 }
  0x28   :  { %320 = vmatpush.bf16.msra.mxu1 %v522_v33 }
  0x2b   :  { %151 = vmatpush.bf16.msra.mxu0 %v512_v7 }
  0x2c   :  { %321 = vmatpush.bf16.msra.mxu1 %v521_v41 }
  0x2e   :  { %152 = vmatmul.bf16.vlgmr.msra.gmra.mxu0 %v511_v8 }
  0x30   :  { %322 = vmatpush.bf16.msra.mxu1 %v520_v48 }
  0xab   :  { %v153_v11 = vpop.f32.mrf.mxu0 }
  0xac   :  { %v698_v12 = vadd.f32 %v536_v9, %v153_v11 }
  0xae   :  { %v701_v13 = vmul.f32 0.70710677, %v698_v12 }
  0xb0   :  { %v162_v15 = vmul.f32 %v701_v13, %v701_v13 }
  0xb2   :  { %v163_v17 = vmin.f32 %v162_v15, 16.0 }
  0xb3   :  { %v155_v18 = vpop.f32.mrf.mxu0 }
  0xb4   :  { %v164_v19 = vmul.f32 2.1237322e-06, %v163_v17  ;;  %v705_v20 = vadd.f32 %v536_v9, %v155_v18  ;;  %v175_v22 = vmul.f32 3.8918573e-05, %v163_v17 }
  0xb6   :  { %v165_v23 = vadd.f32 0.00028619796, %v164_v19  ;;  %v708_v24 = vmul.f32 0.70710677, %v705_v20  ;;  %v176_v25 = vadd.f32 0.001143296, %v175_v22 }
  0xb8   :  { %v202_v26 = vmul.f32 %v708_v24, %v708_v24  ;;  %v166_v28 = vmul.f32 %v165_v23, %v163_v17  ;;  %v177_v29 = vmul.f32 %v176_v25, %v163_v17 }
  0xba   :  { %v203_v30 = vmin.f32 %v202_v26, 16.0  ;;  %v178_v31 = vadd.f32 0.014752088, %v177_v29  ;;  %v167_v35 = vadd.f32 0.0036580483, %v166_v28 }
  0xbc   :  { %v204_v32 = vmul.f32 2.1237322e-06, %v203_v30  ;;  %v215_v34 = vmul.f32 3.8918573e-05, %v203_v30  ;;  %v179_v36 = vmul.f32 %v178_v31, %v163_v17  ;;  %v168_v43 = vmul.f32 %v167_v35, %v163_v17 }
  0xbd   :  { %v159_v35 = vmul.f32 0.5, %v705_v20 }
  0xbe   :  { %v205_v37 = vadd.f32 0.00028619796, %v204_v32  ;;  %v216_v38 = vadd.f32 0.001143296, %v215_v34  ;;  %v180_v39 = vadd.f32 0.112945676, %v179_v36 }
  0xbf   :  { %v169_v50 = vadd.f32 0.05243302, %v168_v43  ;;  %v158_v34 = vmul.f32 0.5, %v698_v12 }
  0xc0   :  { %v206_v40 = vmul.f32 %v205_v37, %v203_v30  ;;  %v217_v42 = vmul.f32 %v216_v38, %v203_v30  ;;  %v181_v44 = vmul.f32 %v180_v39, %v163_v17 }
  0xc1   :  { %v170_v56 = vmul.f32 %v169_v50, %v163_v17 }
  0xc2   :  { %v207_v45 = vadd.f32 0.0036580483, %v206_v40  ;;  %v218_v46 = vadd.f32 0.014752088, %v217_v42  ;;  %v182_v47 = vadd.f32 0.4994258, %v181_v44 }
  0xc3   :  { %v171_v60 = vadd.f32 0.18741608, %v170_v56 }
  0xc4   :  { %v219_v49 = vmul.f32 %v218_v46, %v203_v30  ;;  %v183_v51 = vmul.f32 %v182_v47, %v163_v17  ;;  %v208_v52 = vmul.f32 %v207_v45, %v203_v30 }
  0xc5   :  { %v172_v1 = vmul.f32 %v171_v60, %v163_v17 }
  0xc6   :  { %v220_v53 = vadd.f32 0.112945676, %v219_v49  ;;  %v184_v54 = vadd.f32 1.0, %v183_v51  ;;  %v209_v57 = vadd.f32 0.05243302, %v208_v52 }
  0xc7   :  { %v173_v7 = vadd.f32 1.1283791, %v172_v1 }
  0xc8   :  { %v221_v55 = vmul.f32 %v220_v53, %v203_v30  ;;  %538 = vrcp.f32 %v184_v54  ;;  %v210_v61 = vmul.f32 %v209_v57, %v203_v30  ;;  %v196_v4 = vand.u32 2147483648, %v184_v54 }
  0xc9   :  { %v194_v6 = vand.u32 2147483647, %v184_v54  ;;  %vm190_vm1 = vweird.f32 %v184_v54  ;;  %v174_v16 = vmul.f32 %v173_v7, %v701_v13 }
  0xca   :  { %v222_v58 = vadd.f32 0.4994258, %v221_v55  ;;  %v211_v2 = vadd.f32 0.18741608, %v210_v61  ;;  %v197_v11 = vor.u32 1.1754944e-38, %v196_v4 }
  0xcb   :  { %vm195_vm3 = vcmp.eq.f32.partialorder %v194_v6, 8.507059e+37 }
  0xcc   :  { %v223_v59 = vmul.f32 %v222_v58, %v203_v30  ;;  %v212_v9 = vmul.f32 %v211_v2, %v203_v30 }
  0xce   :  { %v224_v62 = vadd.f32 1.0, %v223_v59  ;;  %v539_v63 = vpop.eup %538  ;;  %v213_v19 = vadd.f32 1.1283791, %v212_v9 }
  0xcf   :  { %v186_v0 = vmul.f32 %v539_v63, %v184_v54  ;;  %vm191_vm0 = vweird.f32 %v539_v63 }
  0xd0   :  { %540 = vrcp.f32 %v224_v62  ;;  %vm192_vm2 = vmor %vm190_vm1, %vm191_vm0  ;;  %v236_v21 = vand.u32 2147483648, %v224_v62  ;;  %v234_v25 = vand.u32 2147483647, %v224_v62  ;;  %vm230_vm5 = vweird.f32 %v224_v62 }
  0xd1   :  { %v187_v3 = vsub.f32 1.0, %v186_v0  ;;  %v214_v28 = vmul.f32 %v213_v19, %v708_v24  ;;  %v537_v24 = vld [vmem:[%s739_s4] ss:$0 sm:$0xff]  ;;  %s653_s4 = smov [#allocation8]  }
  0xd2   :  { %v237_v27 = vor.u32 1.1754944e-38, %v236_v21  ;;  %vm235_vm7 = vcmp.eq.f32.partialorder %v234_v25, 8.507059e+37  ;;  %s423_s10 = sshll.u32 %s653_s4, 4  ;;  %s424_s10 = int_to_ptr.vmem [resolvable:$true] %s423_s10 }
  0xd3   :  { %v188_v5 = vmul.f32 %v539_v63, %v187_v3 }
  0xd5   :  { %v189_v10 = vadd.f32 %v539_v63, %v188_v5 }
  0xd6   :  { %v541_v8 = vpop.eup %540 }
  0xd7   :  { %v226_v14 = vmul.f32 %v541_v8, %v224_v62  ;;  %v193_v15 = vsel %vm192_vm2, %v539_v63, %v189_v10  ;;  %vm231_vm4 = vweird.f32 %v541_v8 }
  0xd8   :  { %v198_v18 = vsel %vm195_vm3, %v197_v11, %v193_v15  ;;  %vm232_vm6 = vmor %vm230_vm5, %vm231_vm4 }
  0xd9   :  { %v227_v17 = vsub.f32 1.0, %v226_v14  ;;  %v199_v22 = vmul.f32 %v198_v18, %v174_v16 }
  0xdb   :  { %v228_v23 = vmul.f32 %v541_v8, %v227_v17  ;;  %v475_v29 = vclamps-f32 %v199_v22, 1.0 }
  0xdd   :  { %v229_v26 = vadd.f32 %v541_v8, %v228_v23  ;;  %v242_v33 = vadd.f32 1.0, %v475_v29 }
  0xdf   :  { %v233_v30 = vsel %vm232_vm6, %v541_v8, %v229_v26  ;;  %v244_v37 = vmul.f32 %v242_v33, %v158_v34 }
  0xe0   :  { %v238_v31 = vsel %vm235_vm7, %v237_v27, %v233_v30 }
  0xe1   :  { %v239_v32 = vmul.f32 %v238_v31, %v214_v28 }
  0xe3   :  { %v476_v13 = vclamps-f32 %v239_v32, 1.0 }
  0xe5   :  { %v243_v36 = vadd.f32 1.0, %v476_v13 }
  0xe7   :  { %v245_v38 = vmul.f32 %v243_v36, %v159_v35 }
  0xe9   :  { %v246_v39 = vpack.c.bf16 %v245_v38, %v244_v37 }
  0xeb   :  { %323 = vmatmul.bf16.vlgmr.msra.gmra.mxu1 %v246_v39 }
 0x168   :  { %v324_v40 = vpop.f32.mrf.mxu1 }
 0x169   :  { %v719_v41 = vadd.f32 %v537_v24, %v324_v40 }
 0x16b   :  { %v331_v42 = vmul.f32 0.70710677, %v719_v41 }
 0x16d   :  { %v333_v43 = vmul.f32 %v331_v42, %v331_v42 }
 0x16f   :  { %v334_v44 = vmin.f32 %v333_v43, 16.0 }
 0x170   :  { %v326_v45 = vpop.f32.mrf.mxu1 }
 0x171   :  { %v335_v12 = vmul.f32 2.1237322e-06, %v334_v44  ;;  %v346_v46 = vmul.f32 3.8918573e-05, %v334_v44  ;;  %v722_v20 = vadd.f32 %v537_v24, %v326_v45 }
 0x173   :  { %v336_v47 = vadd.f32 0.00028619796, %v335_v12  ;;  %v347_v48 = vadd.f32 0.001143296, %v346_v46  ;;  %v725_v49 = vmul.f32 0.70710677, %v722_v20 }
 0x174   :  { %v329_v46 = vmul.f32 0.5, %v719_v41  ;;  %v330_v41 = vmul.f32 0.5, %v722_v20 }
 0x175   :  { %v337_v50 = vmul.f32 %v336_v47, %v334_v44  ;;  %v348_v51 = vmul.f32 %v347_v48, %v334_v44  ;;  %v373_v52 = vmul.f32 %v725_v49, %v725_v49 }
 0x177   :  { %v349_v53 = vadd.f32 0.014752088, %v348_v51  ;;  %v338_v54 = vadd.f32 0.0036580483, %v337_v50  ;;  %v374_v55 = vmin.f32 %v373_v52, 16.0 }
 0x179   :  { %v350_v56 = vmul.f32 %v349_v53, %v334_v44  ;;  %v375_v57 = vmul.f32 2.1237322e-06, %v374_v55  ;;  %v386_v58 = vmul.f32 3.8918573e-05, %v374_v55  ;;  %v339_v60 = vmul.f32 %v338_v54, %v334_v44 }
 0x17b   :  { %v351_v59 = vadd.f32 0.112945676, %v350_v56  ;;  %v376_v61 = vadd.f32 0.00028619796, %v375_v57  ;;  %v387_v62 = vadd.f32 0.001143296, %v386_v58 }
 0x17c   :  { %v340_v3 = vadd.f32 0.05243302, %v339_v60 }
 0x17d   :  { %v352_v63 = vmul.f32 %v351_v59, %v334_v44  ;;  %v377_v0 = vmul.f32 %v376_v61, %v374_v55  ;;  %v388_v1 = vmul.f32 %v387_v62, %v374_v55 }
 0x17e   :  { %v341_v9 = vmul.f32 %v340_v3, %v334_v44 }
 0x17f   :  { %v353_v2 = vadd.f32 0.4994258, %v352_v63  ;;  %v389_v4 = vadd.f32 0.014752088, %v388_v1  ;;  %v378_v6 = vadd.f32 0.0036580483, %v377_v0 }
 0x180   :  { %v342_v15 = vadd.f32 0.18741608, %v341_v9 }
 0x181   :  { %v354_v5 = vmul.f32 %v353_v2, %v334_v44  ;;  %v390_v7 = vmul.f32 %v389_v4, %v374_v55  ;;  %v379_v11 = vmul.f32 %v378_v6, %v374_v55 }
 0x182   :  { %v343_v21 = vmul.f32 %v342_v15, %v334_v44 }
 0x183   :  { %v355_v8 = vadd.f32 1.0, %v354_v5  ;;  %v391_v10 = vadd.f32 0.112945676, %v390_v7  ;;  %v380_v18 = vadd.f32 0.05243302, %v379_v11 }
 0x184   :  { %v344_v28 = vadd.f32 1.1283791, %v343_v21 }
 0x185   :  { %542 = vrcp.f32 %v355_v8  ;;  %v392_v14 = vmul.f32 %v391_v10, %v374_v55  ;;  %v381_v25 = vmul.f32 %v380_v18, %v374_v55  ;;  %v367_v27 = vand.u32 2147483648, %v355_v8 }
 0x186   :  { %v365_v30 = vand.u32 2147483647, %v355_v8  ;;  %vm361_vm9 = vweird.f32 %v355_v8  ;;  %v345_v34 = vmul.f32 %v344_v28, %v331_v42 }
 0x187   :  { %v393_v16 = vadd.f32 0.4994258, %v392_v14  ;;  %v382_v31 = vadd.f32 0.18741608, %v381_v25  ;;  %v368_v13 = vor.u32 1.1754944e-38, %v367_v27 }
 0x188   :  { %vm366_vm11 = vcmp.eq.f32.partialorder %v365_v30, 8.507059e+37 }
 0x189   :  { %v394_v17 = vmul.f32 %v393_v16, %v374_v55  ;;  %v383_v37 = vmul.f32 %v382_v31, %v374_v55 }
 0x18b   :  { %v543_v19 = vpop.eup %542  ;;  %v395_v23 = vadd.f32 1.0, %v394_v17  ;;  %v384_v44 = vadd.f32 1.1283791, %v383_v37 }
 0x18c   :  { %v357_v22 = vmul.f32 %v543_v19, %v355_v8  ;;  %vm362_vm8 = vweird.f32 %v543_v19 }
 0x18d   :  { %544 = vrcp.f32 %v395_v23  ;;  %vm363_vm10 = vmor %vm361_vm9, %vm362_vm8  ;;  %v407_v43 = vand.u32 2147483648, %v395_v23  ;;  %v405_v12 = vand.u32 2147483647, %v395_v23  ;;  %vm401_vm13 = vweird.f32 %v395_v23 }
 0x18e   :  { %v358_v26 = vsub.f32 1.0, %v357_v22  ;;  %v385_v51 = vmul.f32 %v384_v44, %v725_v49 }
 0x18f   :  { %v408_v42 = vor.u32 1.1754944e-38, %v407_v43  ;;  %vm406_vm15 = vcmp.eq.f32.partialorder %v405_v12, 8.507059e+37 }
 0x190   :  { %v359_v29 = vmul.f32 %v543_v19, %v358_v26 }
 0x192   :  { %v360_v32 = vadd.f32 %v543_v19, %v359_v29 }
 0x193   :  { %v545_v33 = vpop.eup %544 }
 0x194   :  { %v364_v35 = vsel %vm363_vm10, %v543_v19, %v360_v32  ;;  %v397_v38 = vmul.f32 %v545_v33, %v395_v23  ;;  %vm402_vm12 = vweird.f32 %v545_v33 }
 0x195   :  { %v369_v36 = vsel %vm366_vm11, %v368_v13, %v364_v35  ;;  %vm403_vm14 = vmor %vm401_vm13, %vm402_vm12 }
 0x196   :  { %v370_v39 = vmul.f32 %v369_v36, %v345_v34  ;;  %v398_v24 = vsub.f32 1.0, %v397_v38 }
 0x198   :  { %v509_v40 = vclamps-f32 %v370_v39, 1.0  ;;  %v399_v45 = vmul.f32 %v545_v33, %v398_v24 }
 0x19a   :  { %v413_v47 = vadd.f32 1.0, %v509_v40  ;;  %v400_v48 = vadd.f32 %v545_v33, %v399_v45 }
 0x19c   :  { %v415_v50 = vmul.f32 %v413_v47, %v329_v46  ;;  %v404_v52 = vsel %vm403_vm14, %v545_v33, %v400_v48 }
 0x19d   :  { %v409_v53 = vsel %vm406_vm15, %v408_v42, %v404_v52 }
 0x19e   :  { %417 = vst [vmem:[#allocation8] sm:$0xff] %v415_v50  ;;  %v410_v54 = vmul.f32 %v409_v53, %v385_v51 }
 0x1a0   :  { %v510_v55 = vclamps-f32 %v410_v54, 1.0 }
 0x1a2   :  { %v414_v56 = vadd.f32 1.0, %v510_v55 }
 0x1a4   :  { %v416_v57 = vmul.f32 %v414_v56, %v330_v41 }
 0x1a6   :  { %418 = vst [vmem:[#allocation8 + $0x8] sm:$0xff] %v416_v57 }
 0x1a7   :  { %431 = dma.vmem_to_hbm [thread:$0]  %s424_s10, 256, %s426_s13, [#allocation4], %s654_s14, %s654_s14, %s655_s15  }
 0x1a8   :  { %646 = dma.done.wait [#allocation4], 256  }
 0x1a9   :  { %647 = vsyncadd [#allocation4], 4294967040 }
 0x1aa   :  { %436 = vsyncpa [#allocation3], 1 }
 0x1ab   :  { %437 = vsyncpa [#allocation6], 1 }
 0x1ac   :  { %438 = vsyncpa [#allocation4], 1 }

</bundles_post_ra>
